<compile_context>
chip_gen: v5e
topology: v5e:2x2
jax: 0.10.0
libtpu: 0.0.40
codegen_flags: <defaults>
</compile_context>

<pallas_src>
import functools

import jax
import jax.numpy as jnp
from jax import lax
from jax.experimental import pallas as pl
from jax.experimental.pallas import tpu as pltpu

KSIZE = 5     # conv kernel size
PADW = 2      # conv padding
EPS = 1e-5    # batchnorm eps
LANE = 128    # TPU lane width
SUBLANE = 8   # TPU sublane width (f32)

# params layout (flat f32 vector of length 16, lives in SMEM):
#   [0:5]  conv1 weight   [5]  conv1 bias
#   [6]    bn1 gamma      [7]  bn1 beta
#   [8:13] conv2 weight   [13] conv2 bias
#   [14]   bn2 gamma      [15] bn2 beta


def _round_up(v, m):
    return (v + m - 1) // m * m


def _encoder_kernel(params_ref, x_ref, pool_ref, feat_ref, *, n_true, l_true, pool):
    n_pad, l_pad = x_ref.shape
    lp = l_true // pool
    lp_pad = pool_ref.shape[1]

    # ---- scalar parameter reads hoisted out of the FIR loops (SMEM, once) --
    w1 = [params_ref[k] for k in range(KSIZE)]
    b1 = params_ref[KSIZE]
    g1 = params_ref[KSIZE + 1]
    be1 = params_ref[KSIZE + 2]
    w2 = [params_ref[KSIZE + 3 + k] for k in range(KSIZE)]
    b2 = params_ref[2 * KSIZE + 3]
    g2 = params_ref[2 * KSIZE + 4]
    be2 = params_ref[2 * KSIZE + 5]

    # validity mask of the true (N, L) extent inside the (8,128)-padded block
    row = lax.broadcasted_iota(jnp.int32, (n_pad, l_pad), 0)
    col = lax.broadcasted_iota(jnp.int32, (n_pad, l_pad), 1)
    valid = (row < n_true) & (col < l_true)
    inv_count = 1.0 / float(n_true * l_true)

    def conv5(v, w, b):
        # 5-tap FIR: out[i] = sum_k w[k] * v[i + k - PADW] + b.
        # `v` is exactly zero outside the valid window (the wrapper zero-pads
        # x, and each BatchNorm below re-zeroes its output there) and the lane
        # padding is >= PADW, so the wrapped-around lanes of pltpu.roll read
        # zeros -- identical to PyTorch's Conv1d zero padding.  No scratch
        # buffer, no zero-fills, no masked loads/stores.
        acc = None
        for k in range(KSIZE):
            shift = (PADW - k) % l_pad
            t = v if shift == 0 else pltpu.roll(v, shift, axis=1)
            acc = w[k] * t if acc is None else acc + w[k] * t
        return acc + b

    def batchnorm(y, g, be):
        # Training-mode BN of the single channel over the true (N, L) extent,
        # biased variance.  Single fused sum / sum-of-squares pass;
        # var = E[y^2] - mean^2 is fine in f32 at this data scale.
        yv = jnp.where(valid, y, 0.0)
        total = jnp.sum(yv)
        total_sq = jnp.sum(yv * yv)
        mean = total * inv_count
        var = total_sq * inv_count - mean * mean
        scale = g * lax.rsqrt(var + EPS)
        # apply only on the valid window; the padding stays exactly zero so
        # the next conv's wrap/tail reads behave like zero padding.
        return jnp.where(valid, (y - mean) * scale + be, 0.0)

    x = x_ref[...]
    y = batchnorm(conv5(x, w1, b1), g1, be1)
    y = batchnorm(conv5(y, w2, b2), g2, be2)
    feat_ref[...] = y  # single lane-dense full-width store

    # ---- MaxPool1d(pool): one wide lane-dense store -------------------------
    # Per-window maxes (read back from feat_ref to bound the live range of y)
    # are assembled into one (n_pad, lp_pad) register block that is written
    # with a single unmasked store, instead of lp single-lane masked stores.
    colp = lax.broadcasted_iota(jnp.int32, (n_pad, lp_pad), 1)
    acc = jnp.zeros((n_pad, lp_pad), jnp.float32)
    for j in range(lp):
        win = feat_ref[:, j * pool:(j + 1) * pool]
        m = jnp.max(win, axis=1, keepdims=True)
        acc = jnp.where(colp == j, m, acc)
    pool_ref[...] = acc


def encoder_layer(x, params, pool=10):
    """x: (N, 1, L) float32 (NCW). Returns (pooled (N,1,L//pool), features (N,1,L))."""
    N, C, L = x.shape
    assert C == 1
    lp = L // pool

    # lane/sublane-aligned padded layout (>= PADW trailing zero lanes)
    n_pad = _round_up(N, SUBLANE)
    l_pad = _round_up(L + PADW, LANE)
    lp_pad = _round_up(max(lp, 1), LANE)

    x2 = jnp.pad(x[:, 0, :].astype(jnp.float32),
                 ((0, n_pad - N), (0, l_pad - L)))

    cost = pl.CostEstimate(
        flops=int(32 * N * L),                                # 2 convs + 2 BNs + pool
        transcendentals=2,                                    # two rsqrt
        bytes_accessed=int(4 * (2 * n_pad * l_pad + n_pad * lp_pad) + 64),
    )

    pooled, feat = pl.pallas_call(
        functools.partial(_encoder_kernel, n_true=N, l_true=L, pool=pool),
        out_shape=(
            jax.ShapeDtypeStruct((n_pad, lp_pad), jnp.float32),   # pooled
            jax.ShapeDtypeStruct((n_pad, l_pad), jnp.float32),    # features
        ),
        in_specs=[
            pl.BlockSpec(memory_space=pltpu.MemorySpace.SMEM),    # params (scalars)
            pl.BlockSpec(memory_space=pltpu.MemorySpace.VMEM),    # x
        ],
        out_specs=(
            pl.BlockSpec(memory_space=pltpu.MemorySpace.VMEM),
            pl.BlockSpec(memory_space=pltpu.MemorySpace.VMEM),
        ),
        compiler_params=pltpu.CompilerParams(
            # explicit scoped-VMEM budget: stays well under v7x's 64 MiB
            # physical VMEM and above the small default scoped limits on
            # v5e/v6e for moderate problem sizes.
            vmem_limit_bytes=48 * 1024 * 1024,
        ),
        cost_estimate=cost,
    )(params, x2)

    return (pooled[:N, :lp].reshape(N, 1, lp),
            feat[:N, :L].reshape(N, 1, L))


def ref_forward(x, w1, b1, g1, be1, w2, b2, g2, be2, pool):
    """Pure-JAX reference mirroring the PyTorch forward (training-mode BN)."""
    def conv(v, w, b):
        vp = jnp.pad(v, ((0, 0), (PADW, PADW)))
        out = sum(w[k] * vp[:, k:k + v.shape[1]] for k in range(KSIZE))
        return out + b

    def bn(v, g, be):
        m = v.mean()
        var = ((v - m) ** 2).mean()
        return g * (v - m) / jnp.sqrt(var + EPS) + be

    v = x[:, 0, :]
    v = bn(conv(v, w1, b1), g1, be1)
    v = bn(conv(v, w2, b2), g2, be2)
    feat = v
    lp = v.shape[1] // pool
    pooled = v[:, :lp * pool].reshape(v.shape[0], lp, pool).max(-1)
    return pooled[:, None, :], feat[:, None, :]


if __name__ == "__main__":
    key = jax.random.PRNGKey(0)
    k1, k2, k3, k4, kx = jax.random.split(key, 5)

    N, L, POOL = 3, 303, 10   # small shapes; maxpool default 10 (floor -> 30)

    # deterministic parameter init (Conv1d-style uniform bound, BN gamma=1 beta=0)
    bound = 1.0 / (1 * KSIZE) ** 0.5
    w1 = jax.random.uniform(k1, (KSIZE,), jnp.float32, -bound, bound)
    b1 = jax.random.uniform(k2, (), jnp.float32, -bound, bound)
    w2 = jax.random.uniform(k3, (KSIZE,), jnp.float32, -bound, bound)
    b2 = jax.random.uniform(k4, (), jnp.float32, -bound, bound)
    g1 = jnp.float32(1.0); be1 = jnp.float32(0.0)
    g2 = jnp.float32(1.0); be2 = jnp.float32(0.0)

    params = jnp.concatenate([
        w1, jnp.array([b1, g1, be1], jnp.float32),
        w2, jnp.array([b2, g2, be2], jnp.float32),
    ]).astype(jnp.float32)

    x = jax.random.normal(kx, (N, 1, L), jnp.float32)

    pooled, feat = encoder_layer(x, params, pool=POOL)
    pooled = jax.block_until_ready(pooled)
    feat = jax.block_until_ready(feat)

    ref_pooled, ref_feat = ref_forward(x, w1, b1, g1, be1, w2, b2, g2, be2, POOL)

    assert pooled.shape == (N, 1, L // POOL)
    assert feat.shape == (N, 1, L)
    assert jnp.allclose(pooled, ref_pooled, rtol=1e-4, atol=1e-4)
    assert jnp.allclose(feat, ref_feat, rtol=1e-4, atol=1e-4)

    print("KERNEL_OK")
</pallas_src>

<mosaic_0001>
module attributes {stable_mosaic.version = 11 : i64} {
  func.func @_encoder_kernel(%arg0: memref<16xf32, #tpu.memory_space<smem>>, %arg1: memref<8x384xf32, #tpu.memory_space<vmem>>, %arg2: memref<8x128xf32, #tpu.memory_space<vmem>>, %arg3: memref<8x384xf32, #tpu.memory_space<vmem>>) attributes {dimension_semantics = [], scalar_prefetch = 0 : i64, scratch_operands = 0 : i64, tpu.core_type = #tpu.core_type<tc>} {
    %c0 = arith.constant 0 : index
    %0 = memref.load %arg0[%c0] : memref<16xf32, #tpu.memory_space<smem>>
    %c1 = arith.constant 1 : index
    %1 = memref.load %arg0[%c1] : memref<16xf32, #tpu.memory_space<smem>>
    %c2 = arith.constant 2 : index
    %2 = memref.load %arg0[%c2] : memref<16xf32, #tpu.memory_space<smem>>
    %c3 = arith.constant 3 : index
    %3 = memref.load %arg0[%c3] : memref<16xf32, #tpu.memory_space<smem>>
    %c4 = arith.constant 4 : index
    %4 = memref.load %arg0[%c4] : memref<16xf32, #tpu.memory_space<smem>>
    %c5 = arith.constant 5 : index
    %5 = memref.load %arg0[%c5] : memref<16xf32, #tpu.memory_space<smem>>
    %c6 = arith.constant 6 : index
    %6 = memref.load %arg0[%c6] : memref<16xf32, #tpu.memory_space<smem>>
    %c7 = arith.constant 7 : index
    %7 = memref.load %arg0[%c7] : memref<16xf32, #tpu.memory_space<smem>>
    %c8 = arith.constant 8 : index
    %8 = memref.load %arg0[%c8] : memref<16xf32, #tpu.memory_space<smem>>
    %c9 = arith.constant 9 : index
    %9 = memref.load %arg0[%c9] : memref<16xf32, #tpu.memory_space<smem>>
    %c10 = arith.constant 10 : index
    %10 = memref.load %arg0[%c10] : memref<16xf32, #tpu.memory_space<smem>>
    %c11 = arith.constant 11 : index
    %11 = memref.load %arg0[%c11] : memref<16xf32, #tpu.memory_space<smem>>
    %c12 = arith.constant 12 : index
    %12 = memref.load %arg0[%c12] : memref<16xf32, #tpu.memory_space<smem>>
    %c13 = arith.constant 13 : index
    %13 = memref.load %arg0[%c13] : memref<16xf32, #tpu.memory_space<smem>>
    %c14 = arith.constant 14 : index
    %14 = memref.load %arg0[%c14] : memref<16xf32, #tpu.memory_space<smem>>
    %c15 = arith.constant 15 : index
    %15 = memref.load %arg0[%c15] : memref<16xf32, #tpu.memory_space<smem>>
    %16 = tpu.iota {dimensions = array<i32: 0>} : vector<8x384xi32>
    %17 = tpu.iota {dimensions = array<i32: 1>} : vector<8x384xi32>
    %c3_i32 = arith.constant 3 : i32
    %18 = vector.broadcast %c3_i32 : i32 to vector<8x384xi32>
    %19 = arith.cmpi slt, %16, %18 : vector<8x384xi32>
    %c303_i32 = arith.constant 303 : i32
    %20 = vector.broadcast %c303_i32 : i32 to vector<8x384xi32>
    %21 = arith.cmpi slt, %17, %20 : vector<8x384xi32>
    %22 = arith.andi %19, %21 : vector<8x384xi1>
    %c0_0 = arith.constant 0 : index
    %c0_1 = arith.constant 0 : index
    %23 = vector.load %arg1[%c0_0, %c0_1] : memref<8x384xf32, #tpu.memory_space<vmem>>, vector<8x384xf32>
    %c2_i32 = arith.constant 2 : i32
    %24 = tpu.dynamic_rotate %23 by %c2_i32 dim 1 : vector<8x384xf32>, i32 -> vector<8x384xf32>
    %25 = vector.broadcast %0 : f32 to vector<8x384xf32>
    %26 = arith.mulf %25, %24 : vector<8x384xf32>
    %c1_i32 = arith.constant 1 : i32
    %27 = tpu.dynamic_rotate %23 by %c1_i32 dim 1 : vector<8x384xf32>, i32 -> vector<8x384xf32>
    %28 = vector.broadcast %1 : f32 to vector<8x384xf32>
    %29 = arith.mulf %28, %27 : vector<8x384xf32>
    %30 = arith.addf %26, %29 : vector<8x384xf32>
    %31 = vector.broadcast %2 : f32 to vector<8x384xf32>
    %32 = arith.mulf %31, %23 : vector<8x384xf32>
    %33 = arith.addf %30, %32 : vector<8x384xf32>
    %c383_i32 = arith.constant 383 : i32
    %34 = tpu.dynamic_rotate %23 by %c383_i32 dim 1 : vector<8x384xf32>, i32 -> vector<8x384xf32>
    %35 = vector.broadcast %3 : f32 to vector<8x384xf32>
    %36 = arith.mulf %35, %34 : vector<8x384xf32>
    %37 = arith.addf %33, %36 : vector<8x384xf32>
    %c382_i32 = arith.constant 382 : i32
    %38 = tpu.dynamic_rotate %23 by %c382_i32 dim 1 : vector<8x384xf32>, i32 -> vector<8x384xf32>
    %39 = vector.broadcast %4 : f32 to vector<8x384xf32>
    %40 = arith.mulf %39, %38 : vector<8x384xf32>
    %41 = arith.addf %37, %40 : vector<8x384xf32>
    %42 = vector.broadcast %5 : f32 to vector<8x384xf32>
    %43 = arith.addf %41, %42 : vector<8x384xf32>
    %cst = arith.constant 0.000000e+00 : f32
    %44 = vector.broadcast %cst : f32 to vector<8x384xf32>
    %45 = arith.select %22, %43, %44 : vector<8x384xi1>, vector<8x384xf32>
    %46 = vector.shape_cast %45 : vector<8x384xf32> to vector<1x8x384xf32>
    %cst_2 = arith.constant dense<0.000000e+00> : vector<1xf32>
    %47 = vector.multi_reduction <add>, %46, %cst_2 [1, 2] : vector<1x8x384xf32> to vector<1xf32>
    %48 = vector.shape_cast %47 : vector<1xf32> to vector<1x1x1xf32>
    %49 = vector.extract %48[0, 0, 0] : f32 from vector<1x1x1xf32>
    %50 = arith.mulf %45, %45 : vector<8x384xf32>
    %51 = vector.shape_cast %50 : vector<8x384xf32> to vector<1x8x384xf32>
    %cst_3 = arith.constant dense<0.000000e+00> : vector<1xf32>
    %52 = vector.multi_reduction <add>, %51, %cst_3 [1, 2] : vector<1x8x384xf32> to vector<1xf32>
    %53 = vector.shape_cast %52 : vector<1xf32> to vector<1x1x1xf32>
    %54 = vector.extract %53[0, 0, 0] : f32 from vector<1x1x1xf32>
    %cst_4 = arith.constant 1.100110e-03 : f32
    %55 = arith.mulf %49, %cst_4 : f32
    %cst_5 = arith.constant 1.100110e-03 : f32
    %56 = arith.mulf %54, %cst_5 : f32
    %57 = arith.mulf %55, %55 : f32
    %58 = arith.subf %56, %57 : f32
    %cst_6 = arith.constant 9.99999974E-6 : f32
    %59 = arith.addf %58, %cst_6 : f32
    %60 = math.rsqrt %59 : f32
    %61 = arith.mulf %6, %60 : f32
    %62 = vector.broadcast %55 : f32 to vector<8x384xf32>
    %63 = arith.subf %43, %62 : vector<8x384xf32>
    %64 = vector.broadcast %61 : f32 to vector<8x384xf32>
    %65 = arith.mulf %63, %64 : vector<8x384xf32>
    %66 = vector.broadcast %7 : f32 to vector<8x384xf32>
    %67 = arith.addf %65, %66 : vector<8x384xf32>
    %cst_7 = arith.constant 0.000000e+00 : f32
    %68 = vector.broadcast %cst_7 : f32 to vector<8x384xf32>
    %69 = arith.select %22, %67, %68 : vector<8x384xi1>, vector<8x384xf32>
    %c2_i32_8 = arith.constant 2 : i32
    %70 = tpu.dynamic_rotate %69 by %c2_i32_8 dim 1 : vector<8x384xf32>, i32 -> vector<8x384xf32>
    %71 = vector.broadcast %8 : f32 to vector<8x384xf32>
    %72 = arith.mulf %71, %70 : vector<8x384xf32>
    %c1_i32_9 = arith.constant 1 : i32
    %73 = tpu.dynamic_rotate %69 by %c1_i32_9 dim 1 : vector<8x384xf32>, i32 -> vector<8x384xf32>
    %74 = vector.broadcast %9 : f32 to vector<8x384xf32>
    %75 = arith.mulf %74, %73 : vector<8x384xf32>
    %76 = arith.addf %72, %75 : vector<8x384xf32>
    %77 = vector.broadcast %10 : f32 to vector<8x384xf32>
    %78 = arith.mulf %77, %69 : vector<8x384xf32>
    %79 = arith.addf %76, %78 : vector<8x384xf32>
    %c383_i32_10 = arith.constant 383 : i32
    %80 = tpu.dynamic_rotate %69 by %c383_i32_10 dim 1 : vector<8x384xf32>, i32 -> vector<8x384xf32>
    %81 = vector.broadcast %11 : f32 to vector<8x384xf32>
    %82 = arith.mulf %81, %80 : vector<8x384xf32>
    %83 = arith.addf %79, %82 : vector<8x384xf32>
    %c382_i32_11 = arith.constant 382 : i32
    %84 = tpu.dynamic_rotate %69 by %c382_i32_11 dim 1 : vector<8x384xf32>, i32 -> vector<8x384xf32>
    %85 = vector.broadcast %12 : f32 to vector<8x384xf32>
    %86 = arith.mulf %85, %84 : vector<8x384xf32>
    %87 = arith.addf %83, %86 : vector<8x384xf32>
    %88 = vector.broadcast %13 : f32 to vector<8x384xf32>
    %89 = arith.addf %87, %88 : vector<8x384xf32>
    %cst_12 = arith.constant 0.000000e+00 : f32
    %90 = vector.broadcast %cst_12 : f32 to vector<8x384xf32>
    %91 = arith.select %22, %89, %90 : vector<8x384xi1>, vector<8x384xf32>
    %92 = vector.shape_cast %91 : vector<8x384xf32> to vector<1x8x384xf32>
    %cst_13 = arith.constant dense<0.000000e+00> : vector<1xf32>
    %93 = vector.multi_reduction <add>, %92, %cst_13 [1, 2] : vector<1x8x384xf32> to vector<1xf32>
    %94 = vector.shape_cast %93 : vector<1xf32> to vector<1x1x1xf32>
    %95 = vector.extract %94[0, 0, 0] : f32 from vector<1x1x1xf32>
    %96 = arith.mulf %91, %91 : vector<8x384xf32>
    %97 = vector.shape_cast %96 : vector<8x384xf32> to vector<1x8x384xf32>
    %cst_14 = arith.constant dense<0.000000e+00> : vector<1xf32>
    %98 = vector.multi_reduction <add>, %97, %cst_14 [1, 2] : vector<1x8x384xf32> to vector<1xf32>
    %99 = vector.shape_cast %98 : vector<1xf32> to vector<1x1x1xf32>
    %100 = vector.extract %99[0, 0, 0] : f32 from vector<1x1x1xf32>
    %cst_15 = arith.constant 1.100110e-03 : f32
    %101 = arith.mulf %95, %cst_15 : f32
    %cst_16 = arith.constant 1.100110e-03 : f32
    %102 = arith.mulf %100, %cst_16 : f32
    %103 = arith.mulf %101, %101 : f32
    %104 = arith.subf %102, %103 : f32
    %cst_17 = arith.constant 9.99999974E-6 : f32
    %105 = arith.addf %104, %cst_17 : f32
    %106 = math.rsqrt %105 : f32
    %107 = arith.mulf %14, %106 : f32
    %108 = vector.broadcast %101 : f32 to vector<8x384xf32>
    %109 = arith.subf %89, %108 : vector<8x384xf32>
    %110 = vector.broadcast %107 : f32 to vector<8x384xf32>
    %111 = arith.mulf %109, %110 : vector<8x384xf32>
    %112 = vector.broadcast %15 : f32 to vector<8x384xf32>
    %113 = arith.addf %111, %112 : vector<8x384xf32>
    %cst_18 = arith.constant 0.000000e+00 : f32
    %114 = vector.broadcast %cst_18 : f32 to vector<8x384xf32>
    %115 = arith.select %22, %113, %114 : vector<8x384xi1>, vector<8x384xf32>
    %c0_19 = arith.constant 0 : index
    %c0_20 = arith.constant 0 : index
    %116 = vector.load %arg3[%c0_19, %c0_20] : memref<8x384xf32, #tpu.memory_space<vmem>>, vector<8x384xf32>
    tpu.vector_store %arg3[%c0_19, %c0_20], %115 {strides = array<i32>} : memref<8x384xf32, #tpu.memory_space<vmem>>, vector<8x384xf32>,
    %117 = tpu.iota {dimensions = array<i32: 1>} : vector<8x128xi32>
    %cst_21 = arith.constant 0.000000e+00 : f32
    %118 = vector.broadcast %cst_21 : f32 to vector<8x128xf32>
    %c0_22 = arith.constant 0 : index
    %c0_23 = arith.constant 0 : index
    %119 = vector.load %arg3[%c0_22, %c0_23] : memref<8x384xf32, #tpu.memory_space<vmem>>, vector<8x10xf32>
    %cst_24 = arith.constant dense<0xFF800000> : vector<8xf32>
    %120 = vector.multi_reduction <maximumf>, %119, %cst_24 [1] : vector<8x10xf32> to vector<8xf32>
    %121 = vector.shape_cast %120 : vector<8xf32> to vector<8x1xf32>
    %c0_i32 = arith.constant 0 : i32
    %122 = vector.broadcast %c0_i32 : i32 to vector<8x128xi32>
    %123 = arith.cmpi eq, %117, %122 : vector<8x128xi32>
    %124 = vector.shape_cast %121 : vector<8x1xf32> to vector<8x1xf32>
    %125 = vector.broadcast %124 : vector<8x1xf32> to vector<8x128xf32>
    %126 = arith.select %123, %125, %118 : vector<8x128xi1>, vector<8x128xf32>
    %c0_25 = arith.constant 0 : index
    %c10_26 = arith.constant 10 : index
    %127 = vector.load %arg3[%c0_25, %c10_26] : memref<8x384xf32, #tpu.memory_space<vmem>>, vector<8x10xf32>
    %cst_27 = arith.constant dense<0xFF800000> : vector<8xf32>
    %128 = vector.multi_reduction <maximumf>, %127, %cst_27 [1] : vector<8x10xf32> to vector<8xf32>
    %129 = vector.shape_cast %128 : vector<8xf32> to vector<8x1xf32>
    %c1_i32_28 = arith.constant 1 : i32
    %130 = vector.broadcast %c1_i32_28 : i32 to vector<8x128xi32>
    %131 = arith.cmpi eq, %117, %130 : vector<8x128xi32>
    %132 = vector.shape_cast %129 : vector<8x1xf32> to vector<8x1xf32>
    %133 = vector.broadcast %132 : vector<8x1xf32> to vector<8x128xf32>
    %134 = arith.select %131, %133, %126 : vector<8x128xi1>, vector<8x128xf32>
    %c0_29 = arith.constant 0 : index
    %c20 = arith.constant 20 : index
    %135 = vector.load %arg3[%c0_29, %c20] : memref<8x384xf32, #tpu.memory_space<vmem>>, vector<8x10xf32>
    %cst_30 = arith.constant dense<0xFF800000> : vector<8xf32>
    %136 = vector.multi_reduction <maximumf>, %135, %cst_30 [1] : vector<8x10xf32> to vector<8xf32>
    %137 = vector.shape_cast %136 : vector<8xf32> to vector<8x1xf32>
    %c2_i32_31 = arith.constant 2 : i32
    %138 = vector.broadcast %c2_i32_31 : i32 to vector<8x128xi32>
    %139 = arith.cmpi eq, %117, %138 : vector<8x128xi32>
    %140 = vector.shape_cast %137 : vector<8x1xf32> to vector<8x1xf32>
    %141 = vector.broadcast %140 : vector<8x1xf32> to vector<8x128xf32>
    %142 = arith.select %139, %141, %134 : vector<8x128xi1>, vector<8x128xf32>
    %c0_32 = arith.constant 0 : index
    %c30 = arith.constant 30 : index
    %143 = vector.load %arg3[%c0_32, %c30] : memref<8x384xf32, #tpu.memory_space<vmem>>, vector<8x10xf32>
    %cst_33 = arith.constant dense<0xFF800000> : vector<8xf32>
    %144 = vector.multi_reduction <maximumf>, %143, %cst_33 [1] : vector<8x10xf32> to vector<8xf32>
    %145 = vector.shape_cast %144 : vector<8xf32> to vector<8x1xf32>
    %c3_i32_34 = arith.constant 3 : i32
    %146 = vector.broadcast %c3_i32_34 : i32 to vector<8x128xi32>
    %147 = arith.cmpi eq, %117, %146 : vector<8x128xi32>
    %148 = vector.shape_cast %145 : vector<8x1xf32> to vector<8x1xf32>
    %149 = vector.broadcast %148 : vector<8x1xf32> to vector<8x128xf32>
    %150 = arith.select %147, %149, %142 : vector<8x128xi1>, vector<8x128xf32>
    %c0_35 = arith.constant 0 : index
    %c40 = arith.constant 40 : index
    %151 = vector.load %arg3[%c0_35, %c40] : memref<8x384xf32, #tpu.memory_space<vmem>>, vector<8x10xf32>
    %cst_36 = arith.constant dense<0xFF800000> : vector<8xf32>
    %152 = vector.multi_reduction <maximumf>, %151, %cst_36 [1] : vector<8x10xf32> to vector<8xf32>
    %153 = vector.shape_cast %152 : vector<8xf32> to vector<8x1xf32>
    %c4_i32 = arith.constant 4 : i32
    %154 = vector.broadcast %c4_i32 : i32 to vector<8x128xi32>
    %155 = arith.cmpi eq, %117, %154 : vector<8x128xi32>
    %156 = vector.shape_cast %153 : vector<8x1xf32> to vector<8x1xf32>
    %157 = vector.broadcast %156 : vector<8x1xf32> to vector<8x128xf32>
    %158 = arith.select %155, %157, %150 : vector<8x128xi1>, vector<8x128xf32>
    %c0_37 = arith.constant 0 : index
    %c50 = arith.constant 50 : index
    %159 = vector.load %arg3[%c0_37, %c50] : memref<8x384xf32, #tpu.memory_space<vmem>>, vector<8x10xf32>
    %cst_38 = arith.constant dense<0xFF800000> : vector<8xf32>
    %160 = vector.multi_reduction <maximumf>, %159, %cst_38 [1] : vector<8x10xf32> to vector<8xf32>
    %161 = vector.shape_cast %160 : vector<8xf32> to vector<8x1xf32>
    %c5_i32 = arith.constant 5 : i32
    %162 = vector.broadcast %c5_i32 : i32 to vector<8x128xi32>
    %163 = arith.cmpi eq, %117, %162 : vector<8x128xi32>
    %164 = vector.shape_cast %161 : vector<8x1xf32> to vector<8x1xf32>
    %165 = vector.broadcast %164 : vector<8x1xf32> to vector<8x128xf32>
    %166 = arith.select %163, %165, %158 : vector<8x128xi1>, vector<8x128xf32>
    %c0_39 = arith.constant 0 : index
    %c60 = arith.constant 60 : index
    %167 = vector.load %arg3[%c0_39, %c60] : memref<8x384xf32, #tpu.memory_space<vmem>>, vector<8x10xf32>
    %cst_40 = arith.constant dense<0xFF800000> : vector<8xf32>
    %168 = vector.multi_reduction <maximumf>, %167, %cst_40 [1] : vector<8x10xf32> to vector<8xf32>
    %169 = vector.shape_cast %168 : vector<8xf32> to vector<8x1xf32>
    %c6_i32 = arith.constant 6 : i32
    %170 = vector.broadcast %c6_i32 : i32 to vector<8x128xi32>
    %171 = arith.cmpi eq, %117, %170 : vector<8x128xi32>
    %172 = vector.shape_cast %169 : vector<8x1xf32> to vector<8x1xf32>
    %173 = vector.broadcast %172 : vector<8x1xf32> to vector<8x128xf32>
    %174 = arith.select %171, %173, %166 : vector<8x128xi1>, vector<8x128xf32>
    %c0_41 = arith.constant 0 : index
    %c70 = arith.constant 70 : index
    %175 = vector.load %arg3[%c0_41, %c70] : memref<8x384xf32, #tpu.memory_space<vmem>>, vector<8x10xf32>
    %cst_42 = arith.constant dense<0xFF800000> : vector<8xf32>
    %176 = vector.multi_reduction <maximumf>, %175, %cst_42 [1] : vector<8x10xf32> to vector<8xf32>
    %177 = vector.shape_cast %176 : vector<8xf32> to vector<8x1xf32>
    %c7_i32 = arith.constant 7 : i32
    %178 = vector.broadcast %c7_i32 : i32 to vector<8x128xi32>
    %179 = arith.cmpi eq, %117, %178 : vector<8x128xi32>
    %180 = vector.shape_cast %177 : vector<8x1xf32> to vector<8x1xf32>
    %181 = vector.broadcast %180 : vector<8x1xf32> to vector<8x128xf32>
    %182 = arith.select %179, %181, %174 : vector<8x128xi1>, vector<8x128xf32>
    %c0_43 = arith.constant 0 : index
    %c80 = arith.constant 80 : index
    %183 = vector.load %arg3[%c0_43, %c80] : memref<8x384xf32, #tpu.memory_space<vmem>>, vector<8x10xf32>
    %cst_44 = arith.constant dense<0xFF800000> : vector<8xf32>
    %184 = vector.multi_reduction <maximumf>, %183, %cst_44 [1] : vector<8x10xf32> to vector<8xf32>
    %185 = vector.shape_cast %184 : vector<8xf32> to vector<8x1xf32>
    %c8_i32 = arith.constant 8 : i32
    %186 = vector.broadcast %c8_i32 : i32 to vector<8x128xi32>
    %187 = arith.cmpi eq, %117, %186 : vector<8x128xi32>
    %188 = vector.shape_cast %185 : vector<8x1xf32> to vector<8x1xf32>
    %189 = vector.broadcast %188 : vector<8x1xf32> to vector<8x128xf32>
    %190 = arith.select %187, %189, %182 : vector<8x128xi1>, vector<8x128xf32>
    %c0_45 = arith.constant 0 : index
    %c90 = arith.constant 90 : index
    %191 = vector.load %arg3[%c0_45, %c90] : memref<8x384xf32, #tpu.memory_space<vmem>>, vector<8x10xf32>
    %cst_46 = arith.constant dense<0xFF800000> : vector<8xf32>
    %192 = vector.multi_reduction <maximumf>, %191, %cst_46 [1] : vector<8x10xf32> to vector<8xf32>
    %193 = vector.shape_cast %192 : vector<8xf32> to vector<8x1xf32>
    %c9_i32 = arith.constant 9 : i32
    %194 = vector.broadcast %c9_i32 : i32 to vector<8x128xi32>
    %195 = arith.cmpi eq, %117, %194 : vector<8x128xi32>
    %196 = vector.shape_cast %193 : vector<8x1xf32> to vector<8x1xf32>
    %197 = vector.broadcast %196 : vector<8x1xf32> to vector<8x128xf32>
    %198 = arith.select %195, %197, %190 : vector<8x128xi1>, vector<8x128xf32>
    %c0_47 = arith.constant 0 : index
    %c100 = arith.constant 100 : index
    %199 = vector.load %arg3[%c0_47, %c100] : memref<8x384xf32, #tpu.memory_space<vmem>>, vector<8x10xf32>
    %cst_48 = arith.constant dense<0xFF800000> : vector<8xf32>
    %200 = vector.multi_reduction <maximumf>, %199, %cst_48 [1] : vector<8x10xf32> to vector<8xf32>
    %201 = vector.shape_cast %200 : vector<8xf32> to vector<8x1xf32>
    %c10_i32 = arith.constant 10 : i32
    %202 = vector.broadcast %c10_i32 : i32 to vector<8x128xi32>
    %203 = arith.cmpi eq, %117, %202 : vector<8x128xi32>
    %204 = vector.shape_cast %201 : vector<8x1xf32> to vector<8x1xf32>
    %205 = vector.broadcast %204 : vector<8x1xf32> to vector<8x128xf32>
    %206 = arith.select %203, %205, %198 : vector<8x128xi1>, vector<8x128xf32>
    %c0_49 = arith.constant 0 : index
    %c110 = arith.constant 110 : index
    %207 = vector.load %arg3[%c0_49, %c110] : memref<8x384xf32, #tpu.memory_space<vmem>>, vector<8x10xf32>
    %cst_50 = arith.constant dense<0xFF800000> : vector<8xf32>
    %208 = vector.multi_reduction <maximumf>, %207, %cst_50 [1] : vector<8x10xf32> to vector<8xf32>
    %209 = vector.shape_cast %208 : vector<8xf32> to vector<8x1xf32>
    %c11_i32 = arith.constant 11 : i32
    %210 = vector.broadcast %c11_i32 : i32 to vector<8x128xi32>
    %211 = arith.cmpi eq, %117, %210 : vector<8x128xi32>
    %212 = vector.shape_cast %209 : vector<8x1xf32> to vector<8x1xf32>
    %213 = vector.broadcast %212 : vector<8x1xf32> to vector<8x128xf32>
    %214 = arith.select %211, %213, %206 : vector<8x128xi1>, vector<8x128xf32>
    %c0_51 = arith.constant 0 : index
    %c120 = arith.constant 120 : index
    %215 = vector.load %arg3[%c0_51, %c120] : memref<8x384xf32, #tpu.memory_space<vmem>>, vector<8x10xf32>
    %cst_52 = arith.constant dense<0xFF800000> : vector<8xf32>
    %216 = vector.multi_reduction <maximumf>, %215, %cst_52 [1] : vector<8x10xf32> to vector<8xf32>
    %217 = vector.shape_cast %216 : vector<8xf32> to vector<8x1xf32>
    %c12_i32 = arith.constant 12 : i32
    %218 = vector.broadcast %c12_i32 : i32 to vector<8x128xi32>
    %219 = arith.cmpi eq, %117, %218 : vector<8x128xi32>
    %220 = vector.shape_cast %217 : vector<8x1xf32> to vector<8x1xf32>
    %221 = vector.broadcast %220 : vector<8x1xf32> to vector<8x128xf32>
    %222 = arith.select %219, %221, %214 : vector<8x128xi1>, vector<8x128xf32>
    %c0_53 = arith.constant 0 : index
    %c130 = arith.constant 130 : index
    %223 = vector.load %arg3[%c0_53, %c130] : memref<8x384xf32, #tpu.memory_space<vmem>>, vector<8x10xf32>
    %cst_54 = arith.constant dense<0xFF800000> : vector<8xf32>
    %224 = vector.multi_reduction <maximumf>, %223, %cst_54 [1] : vector<8x10xf32> to vector<8xf32>
    %225 = vector.shape_cast %224 : vector<8xf32> to vector<8x1xf32>
    %c13_i32 = arith.constant 13 : i32
    %226 = vector.broadcast %c13_i32 : i32 to vector<8x128xi32>
    %227 = arith.cmpi eq, %117, %226 : vector<8x128xi32>
    %228 = vector.shape_cast %225 : vector<8x1xf32> to vector<8x1xf32>
    %229 = vector.broadcast %228 : vector<8x1xf32> to vector<8x128xf32>
    %230 = arith.select %227, %229, %222 : vector<8x128xi1>, vector<8x128xf32>
    %c0_55 = arith.constant 0 : index
    %c140 = arith.constant 140 : index
    %231 = vector.load %arg3[%c0_55, %c140] : memref<8x384xf32, #tpu.memory_space<vmem>>, vector<8x10xf32>
    %cst_56 = arith.constant dense<0xFF800000> : vector<8xf32>
    %232 = vector.multi_reduction <maximumf>, %231, %cst_56 [1] : vector<8x10xf32> to vector<8xf32>
    %233 = vector.shape_cast %232 : vector<8xf32> to vector<8x1xf32>
    %c14_i32 = arith.constant 14 : i32
    %234 = vector.broadcast %c14_i32 : i32 to vector<8x128xi32>
    %235 = arith.cmpi eq, %117, %234 : vector<8x128xi32>
    %236 = vector.shape_cast %233 : vector<8x1xf32> to vector<8x1xf32>
    %237 = vector.broadcast %236 : vector<8x1xf32> to vector<8x128xf32>
    %238 = arith.select %235, %237, %230 : vector<8x128xi1>, vector<8x128xf32>
    %c0_57 = arith.constant 0 : index
    %c150 = arith.constant 150 : index
    %239 = vector.load %arg3[%c0_57, %c150] : memref<8x384xf32, #tpu.memory_space<vmem>>, vector<8x10xf32>
    %cst_58 = arith.constant dense<0xFF800000> : vector<8xf32>
    %240 = vector.multi_reduction <maximumf>, %239, %cst_58 [1] : vector<8x10xf32> to vector<8xf32>
    %241 = vector.shape_cast %240 : vector<8xf32> to vector<8x1xf32>
    %c15_i32 = arith.constant 15 : i32
    %242 = vector.broadcast %c15_i32 : i32 to vector<8x128xi32>
    %243 = arith.cmpi eq, %117, %242 : vector<8x128xi32>
    %244 = vector.shape_cast %241 : vector<8x1xf32> to vector<8x1xf32>
    %245 = vector.broadcast %244 : vector<8x1xf32> to vector<8x128xf32>
    %246 = arith.select %243, %245, %238 : vector<8x128xi1>, vector<8x128xf32>
    %c0_59 = arith.constant 0 : index
    %c160 = arith.constant 160 : index
    %247 = vector.load %arg3[%c0_59, %c160] : memref<8x384xf32, #tpu.memory_space<vmem>>, vector<8x10xf32>
    %cst_60 = arith.constant dense<0xFF800000> : vector<8xf32>
    %248 = vector.multi_reduction <maximumf>, %247, %cst_60 [1] : vector<8x10xf32> to vector<8xf32>
    %249 = vector.shape_cast %248 : vector<8xf32> to vector<8x1xf32>
    %c16_i32 = arith.constant 16 : i32
    %250 = vector.broadcast %c16_i32 : i32 to vector<8x128xi32>
    %251 = arith.cmpi eq, %117, %250 : vector<8x128xi32>
    %252 = vector.shape_cast %249 : vector<8x1xf32> to vector<8x1xf32>
    %253 = vector.broadcast %252 : vector<8x1xf32> to vector<8x128xf32>
    %254 = arith.select %251, %253, %246 : vector<8x128xi1>, vector<8x128xf32>
    %c0_61 = arith.constant 0 : index
    %c170 = arith.constant 170 : index
    %255 = vector.load %arg3[%c0_61, %c170] : memref<8x384xf32, #tpu.memory_space<vmem>>, vector<8x10xf32>
    %cst_62 = arith.constant dense<0xFF800000> : vector<8xf32>
    %256 = vector.multi_reduction <maximumf>, %255, %cst_62 [1] : vector<8x10xf32> to vector<8xf32>
    %257 = vector.shape_cast %256 : vector<8xf32> to vector<8x1xf32>
    %c17_i32 = arith.constant 17 : i32
    %258 = vector.broadcast %c17_i32 : i32 to vector<8x128xi32>
    %259 = arith.cmpi eq, %117, %258 : vector<8x128xi32>
    %260 = vector.shape_cast %257 : vector<8x1xf32> to vector<8x1xf32>
    %261 = vector.broadcast %260 : vector<8x1xf32> to vector<8x128xf32>
    %262 = arith.select %259, %261, %254 : vector<8x128xi1>, vector<8x128xf32>
    %c0_63 = arith.constant 0 : index
    %c180 = arith.constant 180 : index
    %263 = vector.load %arg3[%c0_63, %c180] : memref<8x384xf32, #tpu.memory_space<vmem>>, vector<8x10xf32>
    %cst_64 = arith.constant dense<0xFF800000> : vector<8xf32>
    %264 = vector.multi_reduction <maximumf>, %263, %cst_64 [1] : vector<8x10xf32> to vector<8xf32>
    %265 = vector.shape_cast %264 : vector<8xf32> to vector<8x1xf32>
    %c18_i32 = arith.constant 18 : i32
    %266 = vector.broadcast %c18_i32 : i32 to vector<8x128xi32>
    %267 = arith.cmpi eq, %117, %266 : vector<8x128xi32>
    %268 = vector.shape_cast %265 : vector<8x1xf32> to vector<8x1xf32>
    %269 = vector.broadcast %268 : vector<8x1xf32> to vector<8x128xf32>
    %270 = arith.select %267, %269, %262 : vector<8x128xi1>, vector<8x128xf32>
    %c0_65 = arith.constant 0 : index
    %c190 = arith.constant 190 : index
    %271 = vector.load %arg3[%c0_65, %c190] : memref<8x384xf32, #tpu.memory_space<vmem>>, vector<8x10xf32>
    %cst_66 = arith.constant dense<0xFF800000> : vector<8xf32>
    %272 = vector.multi_reduction <maximumf>, %271, %cst_66 [1] : vector<8x10xf32> to vector<8xf32>
    %273 = vector.shape_cast %272 : vector<8xf32> to vector<8x1xf32>
    %c19_i32 = arith.constant 19 : i32
    %274 = vector.broadcast %c19_i32 : i32 to vector<8x128xi32>
    %275 = arith.cmpi eq, %117, %274 : vector<8x128xi32>
    %276 = vector.shape_cast %273 : vector<8x1xf32> to vector<8x1xf32>
    %277 = vector.broadcast %276 : vector<8x1xf32> to vector<8x128xf32>
    %278 = arith.select %275, %277, %270 : vector<8x128xi1>, vector<8x128xf32>
    %c0_67 = arith.constant 0 : index
    %c200 = arith.constant 200 : index
    %279 = vector.load %arg3[%c0_67, %c200] : memref<8x384xf32, #tpu.memory_space<vmem>>, vector<8x10xf32>
    %cst_68 = arith.constant dense<0xFF800000> : vector<8xf32>
    %280 = vector.multi_reduction <maximumf>, %279, %cst_68 [1] : vector<8x10xf32> to vector<8xf32>
    %281 = vector.shape_cast %280 : vector<8xf32> to vector<8x1xf32>
    %c20_i32 = arith.constant 20 : i32
    %282 = vector.broadcast %c20_i32 : i32 to vector<8x128xi32>
    %283 = arith.cmpi eq, %117, %282 : vector<8x128xi32>
    %284 = vector.shape_cast %281 : vector<8x1xf32> to vector<8x1xf32>
    %285 = vector.broadcast %284 : vector<8x1xf32> to vector<8x128xf32>
    %286 = arith.select %283, %285, %278 : vector<8x128xi1>, vector<8x128xf32>
    %c0_69 = arith.constant 0 : index
    %c210 = arith.constant 210 : index
    %287 = vector.load %arg3[%c0_69, %c210] : memref<8x384xf32, #tpu.memory_space<vmem>>, vector<8x10xf32>
    %cst_70 = arith.constant dense<0xFF800000> : vector<8xf32>
    %288 = vector.multi_reduction <maximumf>, %287, %cst_70 [1] : vector<8x10xf32> to vector<8xf32>
    %289 = vector.shape_cast %288 : vector<8xf32> to vector<8x1xf32>
    %c21_i32 = arith.constant 21 : i32
    %290 = vector.broadcast %c21_i32 : i32 to vector<8x128xi32>
    %291 = arith.cmpi eq, %117, %290 : vector<8x128xi32>
    %292 = vector.shape_cast %289 : vector<8x1xf32> to vector<8x1xf32>
    %293 = vector.broadcast %292 : vector<8x1xf32> to vector<8x128xf32>
    %294 = arith.select %291, %293, %286 : vector<8x128xi1>, vector<8x128xf32>
    %c0_71 = arith.constant 0 : index
    %c220 = arith.constant 220 : index
    %295 = vector.load %arg3[%c0_71, %c220] : memref<8x384xf32, #tpu.memory_space<vmem>>, vector<8x10xf32>
    %cst_72 = arith.constant dense<0xFF800000> : vector<8xf32>
    %296 = vector.multi_reduction <maximumf>, %295, %cst_72 [1] : vector<8x10xf32> to vector<8xf32>
    %297 = vector.shape_cast %296 : vector<8xf32> to vector<8x1xf32>
    %c22_i32 = arith.constant 22 : i32
    %298 = vector.broadcast %c22_i32 : i32 to vector<8x128xi32>
    %299 = arith.cmpi eq, %117, %298 : vector<8x128xi32>
    %300 = vector.shape_cast %297 : vector<8x1xf32> to vector<8x1xf32>
    %301 = vector.broadcast %300 : vector<8x1xf32> to vector<8x128xf32>
    %302 = arith.select %299, %301, %294 : vector<8x128xi1>, vector<8x128xf32>
    %c0_73 = arith.constant 0 : index
    %c230 = arith.constant 230 : index
    %303 = vector.load %arg3[%c0_73, %c230] : memref<8x384xf32, #tpu.memory_space<vmem>>, vector<8x10xf32>
    %cst_74 = arith.constant dense<0xFF800000> : vector<8xf32>
    %304 = vector.multi_reduction <maximumf>, %303, %cst_74 [1] : vector<8x10xf32> to vector<8xf32>
    %305 = vector.shape_cast %304 : vector<8xf32> to vector<8x1xf32>
    %c23_i32 = arith.constant 23 : i32
    %306 = vector.broadcast %c23_i32 : i32 to vector<8x128xi32>
    %307 = arith.cmpi eq, %117, %306 : vector<8x128xi32>
    %308 = vector.shape_cast %305 : vector<8x1xf32> to vector<8x1xf32>
    %309 = vector.broadcast %308 : vector<8x1xf32> to vector<8x128xf32>
    %310 = arith.select %307, %309, %302 : vector<8x128xi1>, vector<8x128xf32>
    %c0_75 = arith.constant 0 : index
    %c240 = arith.constant 240 : index
    %311 = vector.load %arg3[%c0_75, %c240] : memref<8x384xf32, #tpu.memory_space<vmem>>, vector<8x10xf32>
    %cst_76 = arith.constant dense<0xFF800000> : vector<8xf32>
    %312 = vector.multi_reduction <maximumf>, %311, %cst_76 [1] : vector<8x10xf32> to vector<8xf32>
    %313 = vector.shape_cast %312 : vector<8xf32> to vector<8x1xf32>
    %c24_i32 = arith.constant 24 : i32
    %314 = vector.broadcast %c24_i32 : i32 to vector<8x128xi32>
    %315 = arith.cmpi eq, %117, %314 : vector<8x128xi32>
    %316 = vector.shape_cast %313 : vector<8x1xf32> to vector<8x1xf32>
    %317 = vector.broadcast %316 : vector<8x1xf32> to vector<8x128xf32>
    %318 = arith.select %315, %317, %310 : vector<8x128xi1>, vector<8x128xf32>
    %c0_77 = arith.constant 0 : index
    %c250 = arith.constant 250 : index
    %319 = vector.load %arg3[%c0_77, %c250] : memref<8x384xf32, #tpu.memory_space<vmem>>, vector<8x10xf32>
    %cst_78 = arith.constant dense<0xFF800000> : vector<8xf32>
    %320 = vector.multi_reduction <maximumf>, %319, %cst_78 [1] : vector<8x10xf32> to vector<8xf32>
    %321 = vector.shape_cast %320 : vector<8xf32> to vector<8x1xf32>
    %c25_i32 = arith.constant 25 : i32
    %322 = vector.broadcast %c25_i32 : i32 to vector<8x128xi32>
    %323 = arith.cmpi eq, %117, %322 : vector<8x128xi32>
    %324 = vector.shape_cast %321 : vector<8x1xf32> to vector<8x1xf32>
    %325 = vector.broadcast %324 : vector<8x1xf32> to vector<8x128xf32>
    %326 = arith.select %323, %325, %318 : vector<8x128xi1>, vector<8x128xf32>
    %c0_79 = arith.constant 0 : index
    %c260 = arith.constant 260 : index
    %327 = vector.load %arg3[%c0_79, %c260] : memref<8x384xf32, #tpu.memory_space<vmem>>, vector<8x10xf32>
    %cst_80 = arith.constant dense<0xFF800000> : vector<8xf32>
    %328 = vector.multi_reduction <maximumf>, %327, %cst_80 [1] : vector<8x10xf32> to vector<8xf32>
    %329 = vector.shape_cast %328 : vector<8xf32> to vector<8x1xf32>
    %c26_i32 = arith.constant 26 : i32
    %330 = vector.broadcast %c26_i32 : i32 to vector<8x128xi32>
    %331 = arith.cmpi eq, %117, %330 : vector<8x128xi32>
    %332 = vector.shape_cast %329 : vector<8x1xf32> to vector<8x1xf32>
    %333 = vector.broadcast %332 : vector<8x1xf32> to vector<8x128xf32>
    %334 = arith.select %331, %333, %326 : vector<8x128xi1>, vector<8x128xf32>
    %c0_81 = arith.constant 0 : index
    %c270 = arith.constant 270 : index
    %335 = vector.load %arg3[%c0_81, %c270] : memref<8x384xf32, #tpu.memory_space<vmem>>, vector<8x10xf32>
    %cst_82 = arith.constant dense<0xFF800000> : vector<8xf32>
    %336 = vector.multi_reduction <maximumf>, %335, %cst_82 [1] : vector<8x10xf32> to vector<8xf32>
    %337 = vector.shape_cast %336 : vector<8xf32> to vector<8x1xf32>
    %c27_i32 = arith.constant 27 : i32
    %338 = vector.broadcast %c27_i32 : i32 to vector<8x128xi32>
    %339 = arith.cmpi eq, %117, %338 : vector<8x128xi32>
    %340 = vector.shape_cast %337 : vector<8x1xf32> to vector<8x1xf32>
    %341 = vector.broadcast %340 : vector<8x1xf32> to vector<8x128xf32>
    %342 = arith.select %339, %341, %334 : vector<8x128xi1>, vector<8x128xf32>
    %c0_83 = arith.constant 0 : index
    %c280 = arith.constant 280 : index
    %343 = vector.load %arg3[%c0_83, %c280] : memref<8x384xf32, #tpu.memory_space<vmem>>, vector<8x10xf32>
    %cst_84 = arith.constant dense<0xFF800000> : vector<8xf32>
    %344 = vector.multi_reduction <maximumf>, %343, %cst_84 [1] : vector<8x10xf32> to vector<8xf32>
    %345 = vector.shape_cast %344 : vector<8xf32> to vector<8x1xf32>
    %c28_i32 = arith.constant 28 : i32
    %346 = vector.broadcast %c28_i32 : i32 to vector<8x128xi32>
    %347 = arith.cmpi eq, %117, %346 : vector<8x128xi32>
    %348 = vector.shape_cast %345 : vector<8x1xf32> to vector<8x1xf32>
    %349 = vector.broadcast %348 : vector<8x1xf32> to vector<8x128xf32>
    %350 = arith.select %347, %349, %342 : vector<8x128xi1>, vector<8x128xf32>
    %c0_85 = arith.constant 0 : index
    %c290 = arith.constant 290 : index
    %351 = vector.load %arg3[%c0_85, %c290] : memref<8x384xf32, #tpu.memory_space<vmem>>, vector<8x10xf32>
    %cst_86 = arith.constant dense<0xFF800000> : vector<8xf32>
    %352 = vector.multi_reduction <maximumf>, %351, %cst_86 [1] : vector<8x10xf32> to vector<8xf32>
    %353 = vector.shape_cast %352 : vector<8xf32> to vector<8x1xf32>
    %c29_i32 = arith.constant 29 : i32
    %354 = vector.broadcast %c29_i32 : i32 to vector<8x128xi32>
    %355 = arith.cmpi eq, %117, %354 : vector<8x128xi32>
    %356 = vector.shape_cast %353 : vector<8x1xf32> to vector<8x1xf32>
    %357 = vector.broadcast %356 : vector<8x1xf32> to vector<8x128xf32>
    %358 = arith.select %355, %357, %350 : vector<8x128xi1>, vector<8x128xf32>
    %c0_87 = arith.constant 0 : index
    %c0_88 = arith.constant 0 : index
    %359 = vector.load %arg2[%c0_87, %c0_88] : memref<8x128xf32, #tpu.memory_space<vmem>>, vector<8x128xf32>
    tpu.vector_store %arg2[%c0_87, %c0_88], %358 {strides = array<i32>} : memref<8x128xf32, #tpu.memory_space<vmem>>, vector<8x128xf32>,
    return
  }
}

</mosaic_0001>

<bundles_post_ra>
// kernel: tpu_custom_call.1
= control target key start
LH: loop header
LB: loop body
LE: loop exit
PB: predicated region body
PF: predicated region fallthrough
CT: control target
= control target key end

     0   :  { %9 = vsyncpa [#allocation5], 0  ;;  %s941_s0 = inlined_call_operand.hbm [shape: f32[16], index: 0, kind: input, shape index: {}]   ;;  %s942_s1 = inlined_call_operand.hbm [shape: f32[8,384], index: 1, kind: input, shape index: {}]   ;;  %s943_s2 = inlined_call_operand.hbm [shape: f32[8,128], index: 2, kind: output, shape index: {0}]   ;;  %s944_s3 = inlined_call_operand.hbm [shape: f32[8,384], index: 3, kind: output, shape index: {1}]  }
   0x1   :  { %10 = vsyncpa [#allocation3], 0 }
   0x2   :  { %11 = vsyncpa [#allocation4], 0 }
   0x3   :  { %12 = vsyncpa [#allocation9], 0  ;;  %s18_s14 = sshll.u32 %s941_s0, 4  ;;  %s27_s17 = sshll.u32 %s942_s1, 4  ;;  %s19_s14 = int_to_ptr.hbm [resolvable:$true] %s18_s14  ;;  %s28_s17 = int_to_ptr.hbm [resolvable:$true] %s27_s17 }
   0x4   :  { %s703_s18 = smov [#allocation2]   ;;  %s704_s19 = smov [#allocation6]  }
   0x5   :  { %21 = dma.hbm_to_smem %s19_s14, 16, %s703_s18, [#allocation5]  }
   0x6   :  { %s29_s20 = sshll.u32 %s704_s19, 4  ;;  %s30_s20 = int_to_ptr.vmem [resolvable:$true] %s29_s20 }
   0x7   :  { %32 = dma.hbm_to_vmem [thread:$0]  %s28_s17, 384, %s30_s20, [#allocation3]  }
   0x8   :  { %695 = dma.done.wait [#allocation5], 16  }
   0x9   :  { %696 = vsyncadd [#allocation5], 4294967280 }
   0xa   :  { %697 = dma.done.wait [#allocation3], 384  }
   0xb   :  { %698 = vsyncadd [#allocation3], 4294966912 }
   0xc   :  { %41 = sfence }
   0xd   :  { %v73_v0 = vld [vmem:[#allocation6 + $0x10] sm:$0xff]  ;;  %v71_v1 = vld [vmem:[#allocation6] sm:$0xff]  ;;  %s705_s0 = smov 2   ;;  %v72_v2 = vld [vmem:[#allocation6 + $0x8] sm:$0xff]  ;;  %s706_s1 = smov 1   ;;  %v58_v6 = vlaneseq  ;;  %vm360_vm13 = vcmask 244896  }
   0xe   :  { %78 = vrot.lane.b32.xlu1 %v73_v0, %s705_s0  ;;  %74 = vrot.lane.b32.xlu0 %v71_v1, %s705_s0  ;;  %s707_s21 = smov 127   ;;  %s708_s22 = smov 126   ;;  %vm354_vm14 = vcmask 162896   ;;  %vm348_vm15 = vcmask 80896  }
   0xf   :  { %90 = vrot.lane.b32.xlu2 %v72_v2, %s706_s1  ;;  %s572_s23 = sld [smem:[#allocation2 + $0x1]]  ;;  %v749_v8 = vand.u32 127, %v58_v6  ;;  %v772_v40 = vshrl.u32 %v58_v6, 7 }
  0x10   :  { %s42_s24 = sld [smem:[#allocation2]] }
  0x11   :  { %s573_s25 = sld [smem:[#allocation2 + $0x2]]  ;;  %vm94_vm0 = vcmp.lt.s32.totalorder %v749_v8, 1  ;;  %vm80_vm1 = vcmp.lt.s32.totalorder %v749_v8, 2  ;;  %vm118_vm2 = vcmp.lt.s32.totalorder %v749_v8, 127  ;;  %v63_v41 = vadd.s32 256, %v749_v8 }
  0x12   :  { %s574_s26 = sld [smem:[#allocation2 + $0x3]]  ;;  %vm135_vm3 = vcmp.lt.s32.totalorder %v749_v8, 126  ;;  %vm64_vm4 = vcmp.lt.s32.totalorder %v772_v40, 3 }
  0x13   :  { %s575_s27 = sld [smem:[#allocation2 + $0x4]]  ;;  %vm67_vm5 = vcmp.lt.s32.totalorder %v63_v41, 303 }
  0x14   :  { %s576_s28 = sld [smem:[#allocation2 + $0x5]]  ;;  %vm785_vm6 = vmand %vm64_vm4, %vm67_vm5  ;;  %vm384_vm5 = vcmask 572896  }
  0x15   :  { %v98_v15 = vstv %s572_s23  ;;  %s577_s9 = sld [smem:[#allocation2 + $0x6]] }
  0x16   :  { %88 = vrot.lane.b32.xlu1 %v71_v1, %s706_s1  ;;  %76 = vrot.lane.b32.xlu0 %v72_v2, %s705_s0  ;;  %v84_v16 = vstv %s42_s24  ;;  %s578_s10 = sld [smem:[#allocation2 + $0x7]] }
  0x17   :  { %92 = vrot.lane.b32.xlu2 %v73_v0, %s706_s1  ;;  %v105_v23 = vstv %s573_s25  ;;  %s580_s13 = sld [smem:[#allocation2 + $0x9]] }
  0x18   :  { %v122_v29 = vstv %s574_s26  ;;  %v107_v32 = vmul.f32 %v105_v23, %v72_v2  ;;  %v106_v35 = vmul.f32 %v105_v23, %v71_v1  ;;  %v108_v36 = vmul.f32 %v105_v23, %v73_v0  ;;  %s579_s14 = sld [smem:[#allocation2 + $0x8]] }
  0x19   :  { %v139_v47 = vstv %s575_s27  ;;  %s581_s15 = sld [smem:[#allocation2 + $0xa]] }
  0x1a   :  { %v146_v60 = vstv %s576_s28  ;;  %s582_s16 = sld [smem:[#allocation2 + $0xb]]  ;;  %s709_s28 = smov [#allocation8]  }
  0x1b   :  { %s583_s17 = sld [smem:[#allocation2 + $0xc]] }
  0x1c   :  { %s584_s18 = sld [smem:[#allocation2 + $0xd]] }
  0x1d   :  { %s585_s24 = sld [smem:[#allocation2 + $0xe]] }
  0x1e   :  { %114 = vrot.lane.b32.xlu1 %v72_v2, %s707_s21  ;;  %112 = vrot.lane.b32.xlu0 %v71_v1, %s707_s21  ;;  %s586_s25 = sld [smem:[#allocation2 + $0xf]] }
  0x1f   :  { %116 = vrot.lane.b32.xlu2 %v73_v0, %s707_s21 }
  0x26   :  { %131 = vrot.lane.b32.xlu1 %v72_v2, %s708_s22  ;;  %129 = vrot.lane.b32.xlu0 %v71_v1, %s708_s22 }
  0x27   :  { %133 = vrot.lane.b32.xlu2 %v73_v0, %s708_s22 }
  0x69   :  { %v91_v3 = vpop.permute.xlu2 %90 }
  0x71   :  { %v93_v7 = vpop.permute.xlu2 %92 }
  0x72   :  { %v95_v21 = vsel %vm94_vm0, %v91_v3, %v93_v7 }
  0x73   :  { %v101_v30 = vmul.f32 %v98_v15, %v95_v21 }
  0x79   :  { %v117_v14 = vpop.permute.xlu2 %116 }
  0x80   :  { %v79_v4 = vpop.permute.xlu1 %78  ;;  %v75_v5 = vpop.permute.xlu0 %74 }
  0x81   :  { %v83_v18 = vsel %vm80_vm1, %v79_v4, %v75_v5  ;;  %v134_v45 = vpop.permute.xlu2 %133 }
  0x82   :  { %v85_v27 = vmul.f32 %v84_v16, %v83_v18 }
  0x88   :  { %v89_v9 = vpop.permute.xlu1 %88  ;;  %v77_v10 = vpop.permute.xlu0 %76 }
  0x89   :  { %v96_v11 = vsel %vm94_vm0, %v89_v9, %v91_v3  ;;  %v82_v12 = vsel %vm80_vm1, %v75_v5, %v77_v10  ;;  %v97_v13 = vsel %vm94_vm0, %v93_v7, %v89_v9  ;;  %v81_v17 = vsel %vm80_vm1, %v77_v10, %v79_v4 }
  0x8a   :  { %v100_v19 = vmul.f32 %v98_v15, %v96_v11  ;;  %v86_v20 = vmul.f32 %v84_v16, %v82_v12  ;;  %v99_v22 = vmul.f32 %v98_v15, %v97_v13  ;;  %v87_v24 = vmul.f32 %v84_v16, %v81_v17 }
  0x8c   :  { %v103_v31 = vadd.f32 %v100_v19, %v86_v20  ;;  %v102_v34 = vadd.f32 %v99_v22, %v85_v27  ;;  %v104_v38 = vadd.f32 %v101_v30, %v87_v24 }
  0x8e   :  { %v110_v43 = vadd.f32 %v107_v32, %v103_v31  ;;  %v109_v46 = vadd.f32 %v106_v35, %v102_v34  ;;  %v111_v49 = vadd.f32 %v108_v36, %v104_v38 }
  0x90   :  { %v115_v25 = vpop.permute.xlu1 %114  ;;  %v113_v26 = vpop.permute.xlu0 %112 }
  0x91   :  { %v119_v28 = vsel %vm118_vm2, %v115_v25, %v117_v14  ;;  %v120_v33 = vsel %vm118_vm2, %v113_v26, %v115_v25  ;;  %v121_v37 = vsel %vm118_vm2, %v117_v14, %v113_v26 }
  0x92   :  { %v124_v39 = vmul.f32 %v122_v29, %v119_v28  ;;  %v123_v42 = vmul.f32 %v122_v29, %v120_v33  ;;  %v125_v44 = vmul.f32 %v122_v29, %v121_v37 }
  0x94   :  { %v127_v48 = vadd.f32 %v124_v39, %v110_v43  ;;  %v126_v52 = vadd.f32 %v123_v42, %v109_v46  ;;  %v128_v56 = vadd.f32 %v125_v44, %v111_v49  ;;  %v204_v42 = vstv %s578_s10 }
  0x98   :  { %v132_v50 = vpop.permute.xlu1 %131  ;;  %v130_v51 = vpop.permute.xlu0 %129 }
  0x99   :  { %v136_v53 = vsel %vm135_vm3, %v132_v50, %v134_v45  ;;  %v137_v54 = vsel %vm135_vm3, %v130_v51, %v132_v50  ;;  %v138_v55 = vsel %vm135_vm3, %v134_v45, %v130_v51 }
  0x9a   :  { %v141_v57 = vmul.f32 %v139_v47, %v136_v53  ;;  %v140_v58 = vmul.f32 %v139_v47, %v137_v54  ;;  %v142_v59 = vmul.f32 %v139_v47, %v138_v55 }
  0x9c   :  { %v144_v61 = vadd.f32 %v141_v57, %v127_v48  ;;  %v143_v62 = vadd.f32 %v140_v58, %v126_v52  ;;  %v145_v63 = vadd.f32 %v142_v59, %v128_v56 }
  0x9e   :  { %v147_v1 = vadd.f32 %v146_v60, %v143_v62  ;;  %v148_v2 = vadd.f32 %v146_v60, %v144_v61  ;;  %v789_v3 = vadd.f32 %v146_v60, %v145_v63  ;;  %v233_v62 = vstv %s580_s13 }
  0xa0   :  { %v150_v4 = vsel %vm64_vm4, %v147_v1, 0.0  ;;  %v151_v5 = vsel %vm64_vm4, %v148_v2, 0.0  ;;  %v152_v6 = vsel %vm785_vm6, %v789_v3, 0.0 }
  0xa1   :  { %v153_v7 = vadd.f32 %v151_v5, %v150_v4  ;;  %v164_v9 = vmul.f32 %v150_v4, %v150_v4  ;;  %v165_v10 = vmul.f32 %v151_v5, %v151_v5  ;;  %v166_v12 = vmul.f32 %v152_v6, %v152_v6 }
  0xa2   :  { %v240_v4 = vstv %s581_s15 }
  0xa3   :  { %v154_v11 = vadd.f32 %v153_v7, %v152_v6  ;;  %v167_v13 = vadd.f32 %v165_v10, %v164_v9 }
  0xa5   :  { %155 = vadd.xlane.f32.xlu0 %v154_v11  ;;  %v168_v14 = vadd.f32 %v167_v13, %v166_v12  ;;  %v256_v11 = vstv %s582_s16 }
  0xa7   :  { %169 = vadd.xlane.f32.xlu1 %v168_v14 }
 0x118   :  { %v156_v15 = vpop.xlane.xlu0 %155 }
 0x119   :  { %v157_v16 = vrot.slane %v156_v15, 4 }
 0x11a   :  { %v170_v17 = vpop.xlane.xlu1 %169 }
 0x11b   :  { %v158_v18 = vadd.f32 %v157_v16, %v156_v15  ;;  %v171_v19 = vrot.slane %v170_v17, 4  ;;  %v272_v16 = vstv %s583_s17 }
 0x11d   :  { %v159_v20 = vrot.slane %v158_v18, 2  ;;  %v172_v21 = vadd.f32 %v171_v19, %v170_v17 }
 0x11f   :  { %v173_v22 = vrot.slane %v172_v21, 2  ;;  %v160_v23 = vadd.f32 %v159_v20, %v158_v18 }
 0x121   :  { %v161_v24 = vrot.slane %v160_v23, 1  ;;  %v174_v25 = vadd.f32 %v173_v22, %v172_v21 }
 0x123   :  { %v162_v26 = vadd.f32 %v161_v24, %v160_v23  ;;  %v175_v27 = vrot.slane %v174_v25, 1 }
 0x125   :  { %587 = vpush %v162_v26  ;;  %v176_v28 = vadd.f32 %v175_v27, %v174_v25 }
 0x127   :  { %589 = vpush %v176_v28 }
 0x156   :  { %s588_s29 = spop %587 }
 0x157   :  { %s178_s30 = smul.f32 0.00110011, %s588_s29  ;;  %s554_s29 = sshll.u32 %s709_s28, 4  ;;  %s555_s29 = int_to_ptr.vmem [resolvable:$true] %s554_s29 }
 0x158   :  { %s590_s4 = spop %589 }
 0x159   :  { %s180_s5 = smul.f32 %s178_s30, %s178_s30  ;;  %v196_v37 = vstv %s178_s30 }
 0x15a   :  { %s179_s6 = smul.f32 0.00110011, %s590_s4  ;;  %v197_v38 = vsub.f32 %v147_v1, %v196_v37  ;;  %v198_v39 = vsub.f32 %v148_v2, %v196_v37  ;;  %v199_v49 = vsub.f32 %v789_v3, %v196_v37  ;;  %v220_v2 = vstv %s579_s14 }
 0x15b   :  { %v279_v37 = vstv %s584_s18 }
 0x15c   :  { %s181_s7 = ssub.f32 %s179_s6, %s180_s5  ;;  %s556_s5 = sshll.u32 %s944_s3, 4  ;;  %s557_s5 = int_to_ptr.hbm [resolvable:$true] %s556_s5 }
 0x15d   :  { %s710_s3 = smov [#allocation7]  }
 0x15e   :  { %s182_s8 = sadd.f32 1e-05, %s181_s7  ;;  %s543_s6 = sshll.u32 %s710_s3, 4  ;;  %s544_s6 = int_to_ptr.vmem [resolvable:$true] %s543_s6 }
 0x160   :  { %v183_v29 = vstv %s182_s8 }
 0x161   :  { %607 = vrsqrt.f32 %v183_v29  ;;  %vm190_vm8 = vweird.f32 %v183_v29 }
 0x167   :  { %v608_v30 = vpop.eup %607 }
 0x168   :  { %v185_v31 = vmul.f32 %v608_v30, %v183_v29  ;;  %vm191_vm7 = vweird.f32 %v608_v30 }
 0x169   :  { %vm192_vm9 = vmor %vm190_vm8, %vm191_vm7  ;;  %vm408_vm7 = vcmask 900896   ;;  %vm402_vm8 = vcmask 818896  }
 0x16a   :  { %v186_v32 = vmul.f32 %v608_v30, %v185_v31 }
 0x16c   :  { %v187_v33 = vmul.f32 0.5, %v186_v32 }
 0x16e   :  { %v188_v34 = vsub.f32 1.5, %v187_v33 }
 0x170   :  { %v189_v35 = vmul.f32 %v608_v30, %v188_v34 }
 0x172   :  { %v193_v36 = vsel %vm192_vm9, %v608_v30, %v189_v35  ;;  %vm436_vm9 = vcmask 179296  }
 0x173   :  { %591 = vpush %v193_v36 }
 0x1a4   :  { %s592_s11 = spop %591 }
 0x1a5   :  { %s195_s12 = smul.f32 %s592_s11, %s577_s9  ;;  %s545_s9 = sshll.u32 %s943_s2, 4  ;;  %s546_s9 = int_to_ptr.hbm [resolvable:$true] %s545_s9 }
 0x1a7   :  { %v200_v41 = vstv %s195_s12 }
 0x1a8   :  { %v201_v43 = vmul.f32 %v200_v41, %v197_v38  ;;  %v202_v44 = vmul.f32 %v200_v41, %v198_v39  ;;  %v203_v50 = vmul.f32 %v200_v41, %v199_v49 }
 0x1aa   :  { %v205_v45 = vadd.f32 %v204_v42, %v201_v43  ;;  %v206_v46 = vadd.f32 %v204_v42, %v202_v44  ;;  %v207_v51 = vadd.f32 %v204_v42, %v203_v50 }
 0x1ac   :  { %v800_v47 = vsel %vm64_vm4, %v206_v46, 0.0  ;;  %v208_v48 = vsel %vm64_vm4, %v205_v45, 0.0  ;;  %v210_v52 = vsel %vm785_vm6, %v207_v51, 0.0 }
 0x1ad   :  { %249 = vrot.lane.b32.xlu1 %v800_v47, %s707_s21  ;;  %247 = vrot.lane.b32.xlu0 %v208_v48, %s707_s21  ;;  %v241_v12 = vmul.f32 %v240_v4, %v208_v48  ;;  %v242_v31 = vmul.f32 %v240_v4, %v800_v47  ;;  %v243_v33 = vmul.f32 %v240_v4, %v210_v52 }
 0x1ae   :  { %211 = vrot.lane.b32.xlu2 %v208_v48, %s705_s0 }
 0x1b5   :  { %265 = vrot.lane.b32.xlu0 %v800_v47, %s708_s22 }
 0x1b6   :  { %213 = vrot.lane.b32.xlu2 %v800_v47, %s705_s0 }
 0x1be   :  { %215 = vrot.lane.b32.xlu2 %v210_v52, %s705_s0 }
 0x1c6   :  { %224 = vrot.lane.b32.xlu2 %v208_v48, %s706_s1 }
 0x1ce   :  { %226 = vrot.lane.b32.xlu2 %v800_v47, %s706_s1 }
 0x1d6   :  { %228 = vrot.lane.b32.xlu2 %v210_v52, %s706_s1 }
 0x1de   :  { %251 = vrot.lane.b32.xlu2 %v210_v52, %s707_s21 }
 0x1e6   :  { %263 = vrot.lane.b32.xlu2 %v208_v48, %s708_s22 }
 0x1ee   :  { %267 = vrot.lane.b32.xlu2 %v210_v52, %s708_s22 }
 0x208   :  { %v212_v53 = vpop.permute.xlu2 %211 }
 0x210   :  { %v214_v54 = vpop.permute.xlu2 %213 }
 0x211   :  { %v218_v10 = vsel %vm80_vm1, %v212_v53, %v214_v54 }
 0x212   :  { %v222_v21 = vmul.f32 %v220_v2, %v218_v10 }
 0x218   :  { %v216_v55 = vpop.permute.xlu2 %215 }
 0x219   :  { %v219_v61 = vsel %vm80_vm1, %v216_v55, %v212_v53  ;;  %v217_v13 = vsel %vm80_vm1, %v214_v54, %v216_v55  ;;  %vm372_vm1 = vcmask 408896  }
 0x21a   :  { %v221_v3 = vmul.f32 %v220_v2, %v219_v61  ;;  %v223_v23 = vmul.f32 %v220_v2, %v217_v13 }
 0x21f   :  { %v248_v60 = vpop.permute.xlu0 %247  ;;  %v250_v5 = vpop.permute.xlu1 %249 }
 0x220   :  { %v225_v56 = vpop.permute.xlu2 %224  ;;  %v254_v14 = vsel %vm118_vm2, %v248_v60, %v250_v5 }
 0x221   :  { %v257_v24 = vmul.f32 %v256_v11, %v254_v14 }
 0x227   :  { %v266_v17 = vpop.permute.xlu0 %265 }
 0x228   :  { %v227_v57 = vpop.permute.xlu2 %226 }
 0x229   :  { %v231_v6 = vsel %vm94_vm0, %v225_v56, %v227_v57 }
 0x22a   :  { %v235_v15 = vmul.f32 %v233_v62, %v231_v6 }
 0x22c   :  { %v238_v27 = vadd.f32 %v235_v15, %v222_v21 }
 0x22e   :  { %v245_v36 = vadd.f32 %v242_v31, %v238_v27  ;;  %v337_v27 = vstv %s586_s25 }
 0x230   :  { %v229_v58 = vpop.permute.xlu2 %228 }
 0x231   :  { %v232_v59 = vsel %vm94_vm0, %v229_v58, %v225_v56  ;;  %v230_v9 = vsel %vm94_vm0, %v227_v57, %v229_v58  ;;  %vm378_vm0 = vcmask 490896  }
 0x232   :  { %v234_v63 = vmul.f32 %v233_v62, %v232_v59  ;;  %v236_v18 = vmul.f32 %v233_v62, %v230_v9 }
 0x234   :  { %v237_v7 = vadd.f32 %v234_v63, %v221_v3  ;;  %v239_v29 = vadd.f32 %v236_v18, %v223_v23 }
 0x236   :  { %v244_v19 = vadd.f32 %v241_v12, %v237_v7  ;;  %v246_v38 = vadd.f32 %v243_v33, %v239_v29 }
 0x238   :  { %v252_v1 = vpop.permute.xlu2 %251  ;;  %v260_v30 = vadd.f32 %v257_v24, %v244_v19 }
 0x239   :  { %v253_v25 = vsel %vm118_vm2, %v250_v5, %v252_v1  ;;  %v255_v28 = vsel %vm118_vm2, %v252_v1, %v248_v60  ;;  %vm366_vm2 = vcmask 326896  }
 0x23a   :  { %v258_v32 = vmul.f32 %v256_v11, %v253_v25  ;;  %v259_v34 = vmul.f32 %v256_v11, %v255_v28 }
 0x23c   :  { %v261_v41 = vadd.f32 %v258_v32, %v245_v36  ;;  %v262_v44 = vadd.f32 %v259_v34, %v246_v38 }
 0x240   :  { %v264_v20 = vpop.permute.xlu2 %263 }
 0x241   :  { %v270_v22 = vsel %vm135_vm3, %v264_v20, %v266_v17 }
 0x242   :  { %v273_v26 = vmul.f32 %v272_v16, %v270_v22 }
 0x244   :  { %v276_v35 = vadd.f32 %v273_v26, %v260_v30 }
 0x246   :  { %v848_v48 = vadd.f32 %v279_v37, %v276_v35 }
 0x248   :  { %v268_v39 = vpop.permute.xlu2 %267  ;;  %v283_v52 = vsel %vm64_vm4, %v848_v48, 0.0 }
 0x249   :  { %v269_v42 = vsel %vm135_vm3, %v266_v17, %v268_v39  ;;  %v271_v43 = vsel %vm135_vm3, %v268_v39, %v264_v20  ;;  %v297_v56 = vmul.f32 %v283_v52, %v283_v52  ;;  %vm396_vm3 = vcmask 736896  }
 0x24a   :  { %v274_v45 = vmul.f32 %v272_v16, %v269_v42  ;;  %v275_v46 = vmul.f32 %v272_v16, %v271_v43 }
 0x24c   :  { %v277_v47 = vadd.f32 %v274_v45, %v261_v41  ;;  %v278_v49 = vadd.f32 %v275_v46, %v262_v44 }
 0x24e   :  { %v281_v50 = vadd.f32 %v279_v37, %v277_v47  ;;  %v282_v51 = vadd.f32 %v279_v37, %v278_v49 }
 0x250   :  { %v284_v53 = vsel %vm64_vm4, %v281_v50, 0.0  ;;  %v285_v54 = vsel %vm785_vm6, %v282_v51, 0.0 }
 0x251   :  { %v286_v55 = vadd.f32 %v284_v53, %v283_v52  ;;  %v298_v57 = vmul.f32 %v284_v53, %v284_v53  ;;  %v299_v59 = vmul.f32 %v285_v54, %v285_v54 }
 0x253   :  { %v287_v58 = vadd.f32 %v286_v55, %v285_v54  ;;  %v300_v60 = vadd.f32 %v298_v57, %v297_v56 }
 0x255   :  { %288 = vadd.xlane.f32.xlu1 %v287_v58  ;;  %v301_v61 = vadd.f32 %v300_v60, %v299_v59 }
 0x257   :  { %302 = vadd.xlane.f32.xlu0 %v301_v61 }
 0x2c8   :  { %v289_v62 = vpop.xlane.xlu1 %288 }
 0x2c9   :  { %v290_v63 = vrot.slane %v289_v62, 4 }
 0x2ca   :  { %v303_v1 = vpop.xlane.xlu0 %302 }
 0x2cb   :  { %v291_v2 = vadd.f32 %v290_v63, %v289_v62  ;;  %v304_v3 = vrot.slane %v303_v1, 4 }
 0x2cd   :  { %v292_v4 = vrot.slane %v291_v2, 2  ;;  %v305_v5 = vadd.f32 %v304_v3, %v303_v1 }
 0x2cf   :  { %v306_v6 = vrot.slane %v305_v5, 2  ;;  %v293_v7 = vadd.f32 %v292_v4, %v291_v2 }
 0x2d1   :  { %v294_v9 = vrot.slane %v293_v7, 1  ;;  %v307_v10 = vadd.f32 %v306_v6, %v305_v5 }
 0x2d3   :  { %v295_v11 = vadd.f32 %v294_v9, %v293_v7  ;;  %v308_v12 = vrot.slane %v307_v10, 1 }
 0x2d5   :  { %593 = vpush %v295_v11  ;;  %v309_v13 = vadd.f32 %v308_v12, %v307_v10 }
 0x2d7   :  { %595 = vpush %v309_v13 }
 0x306   :  { %s594_s19 = spop %593 }
 0x307   :  { %s311_s20 = smul.f32 0.00110011, %s594_s19 }
 0x308   :  { %s596_s0 = spop %595 }
 0x309   :  { %s313_s1 = smul.f32 %s311_s20, %s311_s20  ;;  %v329_v22 = vstv %s311_s20 }
 0x30a   :  { %s312_s21 = smul.f32 0.00110011, %s596_s0  ;;  %v330_v23 = vsub.f32 %v848_v48, %v329_v22  ;;  %v331_v24 = vsub.f32 %v281_v50, %v329_v22  ;;  %v332_v25 = vsub.f32 %v282_v51, %v329_v22 }
 0x30c   :  { %s314_s22 = ssub.f32 %s312_s21, %s313_s1 }
 0x30e   :  { %s315_s23 = sadd.f32 1e-05, %s314_s22 }
 0x310   :  { %v316_v14 = vstv %s315_s23 }
 0x311   :  { %609 = vrsqrt.f32 %v316_v14  ;;  %vm323_vm11 = vweird.f32 %v316_v14 }
 0x317   :  { %v610_v15 = vpop.eup %609 }
 0x318   :  { %v318_v16 = vmul.f32 %v610_v15, %v316_v14  ;;  %vm324_vm10 = vweird.f32 %v610_v15 }
 0x319   :  { %vm325_vm12 = vmor %vm323_vm11, %vm324_vm10  ;;  %vm430_vm10 = vcmask 97296   ;;  %vm442_vm11 = vcmask 261296  }
 0x31a   :  { %v319_v17 = vmul.f32 %v610_v15, %v318_v16 }
 0x31c   :  { %v320_v18 = vmul.f32 0.5, %v319_v17 }
 0x31e   :  { %v321_v19 = vsub.f32 1.5, %v320_v18 }
 0x320   :  { %v322_v20 = vmul.f32 %v610_v15, %v321_v19 }
 0x322   :  { %v326_v21 = vsel %vm325_vm12, %v610_v15, %v322_v20  ;;  %vm454_vm12 = vcmask 425296  }
 0x323   :  { %597 = vpush %v326_v21 }
 0x354   :  { %s598_s26 = spop %597 }
 0x355   :  { %s328_s27 = smul.f32 %s598_s26, %s585_s24 }
 0x357   :  { %v333_v26 = vstv %s328_s27 }
 0x358   :  { %v334_v28 = vmul.f32 %v333_v26, %v330_v23  ;;  %v335_v29 = vmul.f32 %v333_v26, %v331_v24  ;;  %v336_v30 = vmul.f32 %v333_v26, %v332_v25 }
 0x35a   :  { %v338_v31 = vadd.f32 %v337_v27, %v334_v28  ;;  %v339_v32 = vadd.f32 %v337_v27, %v335_v29  ;;  %v340_v33 = vadd.f32 %v337_v27, %v336_v30 }
 0x35c   :  { %v860_v34 = vsel %vm64_vm4, %v338_v31, 0.0  ;;  %v864_v35 = vsel %vm64_vm4, %v339_v32, 0.0  ;;  %v868_v36 = vsel %vm785_vm6, %v340_v33, 0.0  ;;  %vm390_vm4 = vcmask 654896  }
 0x35d   :  { %344 = vst [vmem:[#allocation8] sm:$0xff] %v860_v34  ;;  %v361_v37 = vsel %vm360_vm13, %v860_v34, -inf  ;;  %v355_v38 = vsel %vm354_vm14, %v860_v34, -inf  ;;  %v349_v39 = vsel %vm348_vm15, %v860_v34, -inf  ;;  %v379_v40 = vsel %vm378_vm0, %v860_v34, -inf }
 0x35e   :  { %345 = vst [vmem:[#allocation8 + $0x8] sm:$0xff] %v864_v35  ;;  %362 = vmax.xlane.f32.xlu0 %v361_v37  ;;  %356 = vmax.xlane.f32.xlu1 %v355_v38  ;;  %v373_v0 = vsel %vm372_vm1, %v860_v34, -inf  ;;  %v367_v41 = vsel %vm366_vm2, %v860_v34, -inf  ;;  %v397_v42 = vsel %vm396_vm3, %v860_v34, -inf  ;;  %v391_v43 = vsel %vm390_vm4, %v860_v34, -inf }
 0x35f   :  { %346 = vst [vmem:[#allocation8 + $0x10] sm:$0xff] %v868_v36  ;;  %350 = vmax.xlane.f32.xlu2 %v349_v39  ;;  %v385_v44 = vsel %vm384_vm5, %v860_v34, -inf  ;;  %vm414_vm6 = vcmask 982896   ;;  %v409_v46 = vsel %vm408_vm7, %v860_v34, -inf  ;;  %v403_v48 = vsel %vm402_vm8, %v860_v34, -inf }
 0x360   :  { %v415_v45 = vsel %vm414_vm6, %v860_v34, -inf  ;;  %v437_v47 = vsel %vm436_vm9, %v864_v35, -inf  ;;  %v431_v49 = vsel %vm430_vm10, %v864_v35, -inf  ;;  %v443_v50 = vsel %vm442_vm11, %v864_v35, -inf  ;;  %559 = dma.vmem_to_hbm [thread:$0]  %s555_s29, 384, %s557_s5, [#allocation9]  }
 0x361   :  { %vm448_vm13 = vcmask 343296   ;;  %vm460_vm14 = vcmask 507296   ;;  %v455_v51 = vsel %vm454_vm12, %v864_v35, -inf  ;;  %vm472_vm15 = vcmask 671296  }
 0x362   :  { %v449_v52 = vsel %vm448_vm13, %v864_v35, -inf  ;;  %v461_v53 = vsel %vm460_vm14, %v864_v35, -inf  ;;  %vm466_vm0 = vcmask 589296   ;;  %vm478_vm1 = vcmask 753296  }
 0x363   :  { %v473_v54 = vsel %vm472_vm15, %v864_v35, -inf  ;;  %v467_v55 = vsel %vm466_vm0, %v864_v35, -inf  ;;  %v479_v56 = vsel %vm478_vm1, %v864_v35, -inf  ;;  %vm421_vm2 = vcmask 1048512  }
 0x364   :  { %vm423_vm3 = vcmask 15360   ;;  %vm490_vm4 = vcmask 917296   ;;  %vm484_vm5 = vcmask 835296   ;;  %v422_v57 = vsel %vm421_vm2, %v860_v34, -inf }
 0x365   :  { %v424_v58 = vsel %vm423_vm3, %v864_v35, -inf  ;;  %v491_v59 = vsel %vm490_vm4, %v864_v35, -inf  ;;  %v485_v60 = vsel %vm484_vm5, %v864_v35, -inf  ;;  %vm504_vm6 = vcmask 1048528  }
 0x366   :  { %380 = vmax.xlane.f32.xlu0 %v379_v40  ;;  %374 = vmax.xlane.f32.xlu1 %v373_v0  ;;  %v425_v61 = vmax.f32 %v422_v57, %v424_v58  ;;  %vm506_vm7 = vcmask 31744   ;;  %v505_v62 = vsel %vm504_vm6, %v864_v35, -inf  ;;  %vm513_vm8 = vcmask 113696  }
 0x367   :  { %368 = vmax.xlane.f32.xlu2 %v367_v41  ;;  %v507_v63 = vsel %vm506_vm7, %v868_v36, -inf  ;;  %vm496_vm9 = vcmask 999296   ;;  %v514_v2 = vsel %vm513_vm8, %v868_v36, -inf  ;;  %vm531_vm10 = vcmask 359696  }
 0x368   :  { %v508_v1 = vmax.f32 %v505_v62, %v507_v63  ;;  %v497_v3 = vsel %vm496_vm9, %v864_v35, -inf  ;;  %vm525_vm11 = vcmask 277696   ;;  %vm519_vm12 = vcmask 195696  }
 0x369   :  { %v532_v4 = vsel %vm531_vm10, %v868_v36, -inf  ;;  %v526_v5 = vsel %vm525_vm11, %v868_v36, -inf  ;;  %v520_v6 = vsel %vm519_vm12, %v868_v36, -inf  ;;  %vm352_vm13 = vcmp.eq.s32.totalorder %v749_v8, 0 }
 0x36a   :  { %vm358_vm14 = vcmp.eq.s32.totalorder %v749_v8, 1  ;;  %vm364_vm15 = vcmp.eq.s32.totalorder %v749_v8, 2  ;;  %vm370_vm0 = vcmp.eq.s32.totalorder %v749_v8, 3  ;;  %vm376_vm1 = vcmp.eq.s32.totalorder %v749_v8, 4 }
 0x36b   :  { %vm382_vm2 = vcmp.eq.s32.totalorder %v749_v8, 5  ;;  %vm388_vm3 = vcmp.eq.s32.totalorder %v749_v8, 6  ;;  %vm394_vm4 = vcmp.eq.s32.totalorder %v749_v8, 7  ;;  %vm400_vm5 = vcmp.eq.s32.totalorder %v749_v8, 8 }
 0x36c   :  { %vm406_vm6 = vcmp.eq.s32.totalorder %v749_v8, 9  ;;  %vm412_vm7 = vcmp.eq.s32.totalorder %v749_v8, 10  ;;  %vm418_vm8 = vcmp.eq.s32.totalorder %v749_v8, 11  ;;  %vm428_vm9 = vcmp.eq.s32.totalorder %v749_v8, 12 }
 0x36d   :  { %vm434_vm10 = vcmp.eq.s32.totalorder %v749_v8, 13  ;;  %vm440_vm11 = vcmp.eq.s32.totalorder %v749_v8, 14  ;;  %vm446_vm12 = vcmp.eq.s32.totalorder %v749_v8, 15 }
 0x36e   :  { %398 = vmax.xlane.f32.xlu0 %v397_v42  ;;  %392 = vmax.xlane.f32.xlu1 %v391_v43 }
 0x36f   :  { %386 = vmax.xlane.f32.xlu2 %v385_v44 }
 0x376   :  { %416 = vmax.xlane.f32.xlu0 %v415_v45  ;;  %410 = vmax.xlane.f32.xlu1 %v409_v46 }
 0x377   :  { %404 = vmax.xlane.f32.xlu2 %v403_v48 }
 0x37e   :  { %438 = vmax.xlane.f32.xlu0 %v437_v47  ;;  %432 = vmax.xlane.f32.xlu1 %v431_v49 }
 0x37f   :  { %444 = vmax.xlane.f32.xlu2 %v443_v50 }
 0x386   :  { %456 = vmax.xlane.f32.xlu0 %v455_v51  ;;  %450 = vmax.xlane.f32.xlu1 %v449_v52 }
 0x387   :  { %462 = vmax.xlane.f32.xlu2 %v461_v53 }
 0x38e   :  { %474 = vmax.xlane.f32.xlu0 %v473_v54  ;;  %468 = vmax.xlane.f32.xlu1 %v467_v55 }
 0x38f   :  { %480 = vmax.xlane.f32.xlu2 %v479_v56 }
 0x396   :  { %492 = vmax.xlane.f32.xlu0 %v491_v59  ;;  %486 = vmax.xlane.f32.xlu1 %v485_v60 }
 0x397   :  { %426 = vmax.xlane.f32.xlu2 %v425_v61 }
 0x39e   :  { %515 = vmax.xlane.f32.xlu0 %v514_v2  ;;  %509 = vmax.xlane.f32.xlu1 %v508_v1 }
 0x39f   :  { %498 = vmax.xlane.f32.xlu2 %v497_v3 }
 0x3a6   :  { %533 = vmax.xlane.f32.xlu0 %v532_v4  ;;  %527 = vmax.xlane.f32.xlu1 %v526_v5 }
 0x3a7   :  { %521 = vmax.xlane.f32.xlu2 %v520_v6 }
 0x3d1   :  { %v363_v7 = vpop.xlane.xlu0 %362  ;;  %v357_v9 = vpop.xlane.xlu1 %356 }
 0x3d2   :  { %v351_v10 = vpop.xlane.xlu2 %350 }
 0x3d3   :  { %v353_v20 = vsel %vm352_vm13, %v351_v10, 0.0  ;;  %vm452_vm13 = vcmp.eq.s32.totalorder %v749_v8, 16 }
 0x3d4   :  { %v359_v23 = vsel %vm358_vm14, %v357_v9, %v353_v20  ;;  %vm458_vm14 = vcmp.eq.s32.totalorder %v749_v8, 17 }
 0x3d5   :  { %v365_v25 = vsel %vm364_vm15, %v363_v7, %v359_v23  ;;  %vm464_vm15 = vcmp.eq.s32.totalorder %v749_v8, 18 }
 0x3d9   :  { %v381_v11 = vpop.xlane.xlu0 %380  ;;  %v375_v12 = vpop.xlane.xlu1 %374 }
 0x3da   :  { %v369_v13 = vpop.xlane.xlu2 %368 }
 0x3db   :  { %v371_v26 = vsel %vm370_vm0, %v369_v13, %v365_v25  ;;  %vm470_vm0 = vcmp.eq.s32.totalorder %v749_v8, 19 }
 0x3dc   :  { %v377_v27 = vsel %vm376_vm1, %v375_v12, %v371_v26  ;;  %vm476_vm1 = vcmp.eq.s32.totalorder %v749_v8, 20 }
 0x3dd   :  { %v383_v31 = vsel %vm382_vm2, %v381_v11, %v377_v27  ;;  %vm482_vm2 = vcmp.eq.s32.totalorder %v749_v8, 21 }
 0x3e1   :  { %v399_v14 = vpop.xlane.xlu0 %398  ;;  %v393_v15 = vpop.xlane.xlu1 %392 }
 0x3e2   :  { %v387_v16 = vpop.xlane.xlu2 %386 }
 0x3e3   :  { %v389_v32 = vsel %vm388_vm3, %v387_v16, %v383_v31  ;;  %vm488_vm3 = vcmp.eq.s32.totalorder %v749_v8, 22 }
 0x3e4   :  { %v395_v33 = vsel %vm394_vm4, %v393_v15, %v389_v32  ;;  %vm494_vm4 = vcmp.eq.s32.totalorder %v749_v8, 23 }
 0x3e5   :  { %v401_v37 = vsel %vm400_vm5, %v399_v14, %v395_v33  ;;  %vm500_vm5 = vcmp.eq.s32.totalorder %v749_v8, 24 }
 0x3e9   :  { %v417_v17 = vpop.xlane.xlu0 %416  ;;  %v411_v18 = vpop.xlane.xlu1 %410 }
 0x3ea   :  { %v405_v19 = vpop.xlane.xlu2 %404 }
 0x3eb   :  { %v407_v38 = vsel %vm406_vm6, %v405_v19, %v401_v37  ;;  %vm511_vm6 = vcmp.eq.s32.totalorder %v749_v8, 25 }
 0x3ec   :  { %v413_v39 = vsel %vm412_vm7, %v411_v18, %v407_v38  ;;  %vm517_vm7 = vcmp.eq.s32.totalorder %v749_v8, 26 }
 0x3ed   :  { %v419_v41 = vsel %vm418_vm8, %v417_v17, %v413_v39  ;;  %vm523_vm8 = vcmp.eq.s32.totalorder %v749_v8, 27 }
 0x3f1   :  { %v439_v21 = vpop.xlane.xlu0 %438  ;;  %v433_v22 = vpop.xlane.xlu1 %432 }
 0x3f2   :  { %v445_v24 = vpop.xlane.xlu2 %444 }
 0x3f9   :  { %v457_v28 = vpop.xlane.xlu0 %456  ;;  %v451_v29 = vpop.xlane.xlu1 %450 }
 0x3fa   :  { %v463_v30 = vpop.xlane.xlu2 %462 }
 0x401   :  { %v475_v34 = vpop.xlane.xlu0 %474  ;;  %v469_v35 = vpop.xlane.xlu1 %468 }
 0x402   :  { %v481_v36 = vpop.xlane.xlu2 %480 }
 0x409   :  { %v493_v40 = vpop.xlane.xlu0 %492  ;;  %v487_v0 = vpop.xlane.xlu1 %486 }
 0x40a   :  { %v427_v42 = vpop.xlane.xlu2 %426 }
 0x40b   :  { %v429_v43 = vsel %vm428_vm9, %v427_v42, %v419_v41  ;;  %vm529_vm9 = vcmp.eq.s32.totalorder %v749_v8, 28 }
 0x40c   :  { %v435_v44 = vsel %vm434_vm10, %v433_v22, %v429_v43  ;;  %vm535_vm10 = vcmp.eq.s32.totalorder %v749_v8, 29 }
 0x40d   :  { %v441_v45 = vsel %vm440_vm11, %v439_v21, %v435_v44 }
 0x40e   :  { %v447_v46 = vsel %vm446_vm12, %v445_v24, %v441_v45 }
 0x40f   :  { %v453_v48 = vsel %vm452_vm13, %v451_v29, %v447_v46 }
 0x410   :  { %v459_v47 = vsel %vm458_vm14, %v457_v28, %v453_v48 }
 0x411   :  { %v510_v49 = vpop.xlane.xlu1 %509  ;;  %v465_v50 = vsel %vm464_vm15, %v463_v30, %v459_v47  ;;  %v516_v51 = vpop.xlane.xlu0 %515 }
 0x412   :  { %v471_v52 = vsel %vm470_vm0, %v469_v35, %v465_v50  ;;  %v499_v53 = vpop.xlane.xlu2 %498 }
 0x413   :  { %v477_v54 = vsel %vm476_vm1, %v475_v34, %v471_v52 }
 0x414   :  { %v483_v55 = vsel %vm482_vm2, %v481_v36, %v477_v54 }
 0x415   :  { %v489_v56 = vsel %vm488_vm3, %v487_v0, %v483_v55 }
 0x416   :  { %v495_v57 = vsel %vm494_vm4, %v493_v40, %v489_v56 }
 0x417   :  { %v501_v58 = vsel %vm500_vm5, %v499_v53, %v495_v57 }
 0x418   :  { %v512_v59 = vsel %vm511_vm6, %v510_v49, %v501_v58 }
 0x419   :  { %v528_v60 = vpop.xlane.xlu1 %527  ;;  %v518_v61 = vsel %vm517_vm7, %v516_v51, %v512_v59  ;;  %v534_v1 = vpop.xlane.xlu0 %533 }
 0x41a   :  { %v522_v62 = vpop.xlane.xlu2 %521 }
 0x41b   :  { %v524_v63 = vsel %vm523_vm8, %v522_v62, %v518_v61 }
 0x41c   :  { %v530_v2 = vsel %vm529_vm9, %v528_v60, %v524_v63 }
 0x41d   :  { %v536_v3 = vsel %vm535_vm10, %v534_v1, %v530_v2 }
 0x41e   :  { %537 = vst [vmem:[#allocation7] sm:$0xff] %v536_v3 }
 0x41f   :  { %548 = dma.vmem_to_hbm [thread:$0]  %s544_s6, 128, %s546_s9, [#allocation4]  }
 0x420   :  { %699 = dma.done.wait [#allocation4], 128  }
 0x421   :  { %700 = vsyncadd [#allocation4], 4294967168 }
 0x422   :  { %701 = dma.done.wait [#allocation9], 384  }
 0x423   :  { %702 = vsyncadd [#allocation9], 4294966912 }
 0x424   :  { %568 = vsyncpa [#allocation3], 1 }
 0x425   :  { %569 = vsyncpa [#allocation4], 1 }
 0x426   :  { %570 = vsyncpa [#allocation9], 1 }
 0x427   :  { %571 = vsyncpa [#allocation5], 1 }

</bundles_post_ra>
